<compile_context>
chip_gen: v7x
topology: tpu7x:2x2x1
jax: 0.10.0
libtpu: 0.0.40
codegen_flags: <defaults>
</compile_context>

<pallas_src>
import jax
import jax.numpy as jnp
from jax.experimental import pallas as pl
from jax.experimental.pallas import tpu as pltpu

MAX_TILE_BYTES = 8 << 20            # 8 MiB/tile -> 32 MiB double-buffered in+out
VMEM_LIMIT_BYTES = 48 << 20         # < v7x 64 MiB physical; ample on v5e/v6e (128 MiB)
SMALL_THRESHOLD_BYTES = 256 << 10   # below this, one full-array block (no step overhead)
MIN_GRID_STEPS = 4                  # aim for >= 4 pipelined steps on mid-size inputs


def _scale_bias_kernel(w_ref, b_ref, x_ref, o_ref):
    # w_ref, b_ref: (1, 1) f32 scalars in SMEM; x_ref / o_ref: VMEM tiles.
    y = x_ref[...].astype(jnp.float32) * w_ref[0, 0] + b_ref[0, 0]
    o_ref[...] = y.astype(o_ref.dtype)


def _round_up(v, m):
    return ((v + m - 1) // m) * m


def _lane_dense_view(x):
    """Copy-free 2D view with the widest 128-aligned lane dim available."""
    n, c, h, w = x.shape
    total = n * c * h * w
    for lanes in (1024, 512, 256, 128):
        if total % lanes == 0:
            return x.reshape(total // lanes, lanes)
    # Fallback: element count not 128-divisible. Still copy-free, but stores are
    # masked partial vst. TODO(synk): only hit for pathologically odd N*C*H*W.
    return x.reshape(n * c * h, w)


def _pick_tile_rows(rows, lanes, itemsize):
    total_bytes = rows * lanes * itemsize
    if total_bytes <= SMALL_THRESHOLD_BYTES:
        return rows                               # single full-array block
    max_rows = max(8, (MAX_TILE_BYTES // (lanes * itemsize)) // 8 * 8)
    target = _round_up(pl.cdiv(rows, MIN_GRID_STEPS), 8)   # >= MIN_GRID_STEPS steps
    tile = min(max_rows, target)
    return rows if tile >= rows else tile


def one_oper_model(x, weight, bias):
    """OneOperModel.forward: nn.Conv2d(1,1,1) == y = w*x + b elementwise.

    x: (N, 1, H, W). weight: conv weight (any shape with 1 element, e.g. (1,1,1,1)).
    bias: conv bias (1 element).
    """
    n, c, h, w = x.shape
    assert c == 1, "Conv2d(1, 1, 1) expects a single input channel"

    w_smem = jnp.asarray(weight, jnp.float32).reshape(1, 1)
    b_smem = jnp.asarray(bias, jnp.float32).reshape(1, 1)

    x2d = _lane_dense_view(x)                     # copy-free reshape, no padding
    rows, lanes = x2d.shape
    tile_rows = _pick_tile_rows(rows, lanes, x.dtype.itemsize)
    num_tiles = pl.cdiv(rows, tile_rows)          # partial last block handled by Pallas

    out2d = pl.pallas_call(
        _scale_bias_kernel,
        out_shape=jax.ShapeDtypeStruct((rows, lanes), x.dtype),
        grid=(num_tiles,),
        in_specs=[
            pl.BlockSpec(memory_space=pltpu.SMEM),               # weight scalar
            pl.BlockSpec(memory_space=pltpu.SMEM),               # bias scalar
            pl.BlockSpec((tile_rows, lanes), lambda i: (i, 0)),
        ],
        out_specs=pl.BlockSpec((tile_rows, lanes), lambda i: (i, 0)),
        compiler_params=pltpu.CompilerParams(
            dimension_semantics=("parallel",),    # shard row-tiles across v7x's 2 TCs
            vmem_limit_bytes=VMEM_LIMIT_BYTES,    # 8 MiB tiles exceed v5e/v6e scoped default
        ),
    )(w_smem, b_smem, x2d)

    return out2d.reshape(n, c, h, w)              # copy-free view back to NCHW


if __name__ == "__main__":
    key = jax.random.PRNGKey(0)
    kx, kw, kb, kx2 = jax.random.split(key, 4)

    # Deterministic Conv2d(1, 1, 1) parameters: weight (1,1,1,1), bias (1,)
    weight = jax.random.normal(kw, (1, 1, 1, 1), dtype=jnp.float32)
    bias = jax.random.normal(kb, (1,), dtype=jnp.float32)
    w_scalar = weight[0, 0, 0, 0]
    b_scalar = bias[0]

    # Small NCHW input consistent with the module: batch=2, channels=1, 16x16.
    # Lane-dense small path: 512 elements -> (1, 512) single block.
    x_small = jax.random.normal(kx, (2, 1, 16, 16), dtype=jnp.float32)
    out_small = jax.block_until_ready(one_oper_model(x_small, weight, bias))
    ref_small = x_small * w_scalar + b_scalar
    assert out_small.shape == x_small.shape
    assert jnp.allclose(out_small, ref_small, atol=1e-6, rtol=1e-6)

    # Larger input to exercise the copy-free, cdiv-tiled, pipelined path:
    # 3*512*512 elems -> (768, 1024) view, 4 row-tiles of 192x1024, no padding.
    x_big = jax.random.normal(kx2, (3, 1, 512, 512), dtype=jnp.float32)
    out_big = jax.block_until_ready(one_oper_model(x_big, weight, bias))
    ref_big = x_big * w_scalar + b_scalar
    assert out_big.shape == x_big.shape
    assert jnp.allclose(out_big, ref_big, atol=1e-6, rtol=1e-6)

    print("KERNEL_OK")
</pallas_src>

<mosaic_0001>
module attributes {stable_mosaic.version = 11 : i64} {
  func.func @_scale_bias_kernel(%arg0: i32, %arg1: memref<1x1xf32, #tpu.memory_space<smem>>, %arg2: memref<1x1xf32, #tpu.memory_space<smem>>, %arg3: memref<1x512xf32, #tpu.memory_space<vmem>>, %arg4: memref<1x512xf32, #tpu.memory_space<vmem>>) attributes {dimension_semantics = [#tpu.dimension_semantics<parallel>], iteration_bounds = array<i64: 1>, scalar_prefetch = 0 : i64, scratch_operands = 0 : i64, tpu.core_type = #tpu.core_type<tc>, window_params = [{transform_indices = @transform_0, window_bounds = array<i64: 1, 1>}, {transform_indices = @transform_1, window_bounds = array<i64: 1, 1>}, {transform_indices = @transform_2, window_bounds = array<i64: 1, 512>}, {transform_indices = @transform_3, window_bounds = array<i64: 1, 512>}]} {
    %c0 = arith.constant 0 : index
    %c0_0 = arith.constant 0 : index
    %0 = vector.load %arg3[%c0, %c0_0] : memref<1x512xf32, #tpu.memory_space<vmem>>, vector<1x512xf32>
    %c0_1 = arith.constant 0 : index
    %c0_2 = arith.constant 0 : index
    %1 = memref.load %arg1[%c0_1, %c0_2] : memref<1x1xf32, #tpu.memory_space<smem>>
    %2 = vector.broadcast %1 : f32 to vector<1x512xf32>
    %3 = arith.mulf %0, %2 : vector<1x512xf32>
    %c0_3 = arith.constant 0 : index
    %c0_4 = arith.constant 0 : index
    %4 = memref.load %arg2[%c0_3, %c0_4] : memref<1x1xf32, #tpu.memory_space<smem>>
    %5 = vector.broadcast %4 : f32 to vector<1x512xf32>
    %6 = arith.addf %3, %5 : vector<1x512xf32>
    %c0_5 = arith.constant 0 : index
    %c0_6 = arith.constant 0 : index
    %7 = vector.load %arg4[%c0_5, %c0_6] : memref<1x512xf32, #tpu.memory_space<vmem>>, vector<1x512xf32>
    tpu.vector_store %arg4[%c0_5, %c0_6], %6 {strides = array<i32>} : memref<1x512xf32, #tpu.memory_space<vmem>>, vector<1x512xf32>,
    return
  }
  func.func @transform_0(%arg0: i32) -> (i32, i32) {
    %c0_i32 = arith.constant 0 : i32
    %c0_i32_0 = arith.constant 0 : i32
    %c0_i32_1 = arith.constant 0 : i32
    return %c0_i32, %c0_i32_0 : i32, i32
  }
  func.func @transform_1(%arg0: i32) -> (i32, i32) {
    %c0_i32 = arith.constant 0 : i32
    %c0_i32_0 = arith.constant 0 : i32
    %c0_i32_1 = arith.constant 0 : i32
    return %c0_i32, %c0_i32_0 : i32, i32
  }
  func.func @transform_2(%arg0: i32) -> (i32, i32) {
    %c0_i32 = arith.constant 0 : i32
    %c0_i32_0 = arith.constant 0 : i32
    return %arg0, %c0_i32 : i32, i32
  }
  func.func @transform_3(%arg0: i32) -> (i32, i32) {
    %c0_i32 = arith.constant 0 : i32
    %c0_i32_0 = arith.constant 0 : i32
    return %arg0, %c0_i32 : i32, i32
  }
}

</mosaic_0001>

<bundles_post_ra>
// kernel: tpu_custom_call.1
= control target key start
LH: loop header
LB: loop body
LE: loop exit
PB: predicated region body
PF: predicated region fallthrough
CT: control target
= control target key end

     0   :  { %v24_v3 = vlaneseq  ;;  %s110_s0 = inlined_call_operand.<no memory space> [shape: f32[1,1], index: 0, kind: input, shape index: {}]   ;;  %s111_s1 = inlined_call_operand.<no memory space> [shape: f32[1,1], index: 1, kind: input, shape index: {}]   ;;  %s112_s2 = inlined_call_operand.vmem [shape: f32[1,512], index: 2, kind: input, shape index: {}]   ;;  %s113_s3 = inlined_call_operand.hbm [shape: f32[1,512], index: 3, kind: output, shape index: {}]  }
   0x1   :  { %v17_v0 = vld [vmem:[%s112_s2] sm:$0xf]  ;;  %v19_v1 = vstv %s110_s0  ;;  %v22_v2 = vstv %s111_s1 }
   0x2   :  { %10 = vsyncpa [#allocation5], 0  ;;  %v20_v4 = vmul.f32 %v19_v1, %v17_v0  ;;  %s68_s18 = smov [#allocation4]   ;;  %vm26_vm0 = vcmp.lt.s32.totalorder %v24_v3, 512 }
   0x3   :  { %s35_s19 = sshll.u32 %s68_s18, 4  ;;  %s36_s19 = int_to_ptr.vmem [resolvable:$true] %s35_s19 }
   0x4   :  { %v23_v5 = vadd.f32 %v22_v2, %v20_v4  ;;  %s44_s20 = scalar_lea.vmem %s36_s19, 64  ;;  %p49_p1 = scmp.lt.s32.totalorder %s36_s19, %s36_s19 }
   0x5   :  { %p45_p0 = scmp.ne.s32.totalorder %s36_s19, %s44_s20  ;;  %p50_p2 = scmp.lt.s32.totalorder %s44_s20, %s44_s20 }
   0x6   :  { %28 = vst.msk [vmem:[#allocation4] sm:$0xf] %vm26_vm0, %v23_v5 }
   0x7   :  { %p51_p3 = por %p50_p2, %p49_p1 }
   0x9   :  { %p52_p4 = pnand %p51_p3, %p45_p0 }
   0xb   :  { %55 = shalt.err (!%p52_p4)
}
   0xc   :  { %s56_s1 = scalar_lea.hbm %s113_s3, 64 }
   0xd   :  { %p57_p5 = scmp.ne.s32.totalorder %s113_s3, %s56_s1  ;;  %p60_p6 = scmp.lt.u32.totalorder %s56_s1, %s113_s3 }
   0xf   :  { %p62_p7 = pnand %p60_p6, %p57_p5 }
  0x11   :  { %65 = shalt.err (!%p62_p7)
}
  0x12   :  { %38 = dma.vmem_to_hbm [thread:$0]  %s36_s19, 64, %s113_s3, [#allocation5]  }
  0x13   :  { %66 = dma.done.wait [#allocation5], 64  }
  0x14   :  { %67 = vsyncadd [#allocation5], 4294967232 }
  0x15   :  { %42 = vsyncpa [#allocation5], 1 }

</bundles_post_ra>
